<compile_context>
chip_gen: v7x
topology: tpu7x:2x2x1
jax: 0.10.0
libtpu: 0.0.40
codegen_flags: <defaults>
</compile_context>

<pallas_src>
import numpy as np
import jax
import jax.numpy as jnp
from jax import lax
from jax.experimental import pallas as pl
from jax.experimental.pallas import tpu as pltpu


def _round_up(x, m):
    return ((x + m - 1) // m) * m


def _interp_matrix(out_size: int, in_size: int) -> np.ndarray:
    """Bilinear align_corners=True interpolation matrix [out, in] (PyTorch semantics)."""
    M = np.zeros((out_size, in_size), np.float32)
    if in_size == 1 or out_size == 1:
        M[:, 0] = 1.0
        return M
    src = np.arange(out_size, dtype=np.float64) * (in_size - 1) / (out_size - 1)
    k0 = np.clip(np.floor(src).astype(np.int64), 0, in_size - 2)
    frac = (src - k0).astype(np.float32)
    rows = np.arange(out_size)
    M[rows, k0] = 1.0 - frac
    M[rows, k0 + 1] = frac
    return M


def _make_kernel(tile_h: int, chunk_w: int, n_chunks: int):
    n_groups = tile_h // 8

    def kernel(kvals_ref, disp_ref, tgt_ref, wh_ref, wwt_ref, out_ref, wtmp_ref):
        b = pl.program_id(0)
        h = pl.program_id(1)

        @pl.when(h == 0)
        def _():
            # Width-resize once per batch (H-tile invariant). The *W disparity
            # scale is already folded into wwt by the wrapper.
            wr = jnp.dot(disp_ref[0], wwt_ref[...],
                         preferred_element_type=jnp.float32)
            wtmp_ref[...] = wr.astype(wtmp_ref.dtype)
            out_ref[...] = jnp.zeros_like(out_ref)

        scale = kvals_ref[b] * jnp.float32(0.54)
        t1 = jnp.float32(1.25)
        t2 = jnp.float32(1.25 ** 2)
        t3 = jnp.float32(1.25 ** 3)

        def process_chunk(off):
            lanes = pl.ds(off, chunk_w)

            # Height-resize this lane chunk: [tile_h, h_in] @ [h_in, chunk_w].
            disp_scaled = jnp.dot(wh_ref[...], wtmp_ref[:, lanes],
                                  preferred_element_type=jnp.float32)
            gt = tgt_ref[0, :, lanes]                       # [tile_h, chunk_w]

            # disp2depth, faithful to PyTorch: denom = disp + (1 - (disp > 0)).
            denom = jnp.where(disp_scaled > 0.0, disp_scaled, disp_scaled + 1.0)
            depth = scale * pl.reciprocal(denom, approx=True)
            depth = jnp.clip(depth, 0.001, 80.0)

            valid = jnp.logical_and(gt > 0.001, gt < 80.0)  # padded pixels (gt=0) -> False
            vf = valid.astype(jnp.float32)
            gt_s = jnp.where(valid, gt, 1.0)
            pd_s = jnp.where(valid, depth, 1.0)

            inv_gt = pl.reciprocal(gt_s, approx=True)
            r = pd_s * inv_gt                               # pd / gt
            diff = gt_s - pd_s
            sq = diff * diff
            lr = jnp.log(r)                                 # log(pd) - log(gt); squared below
            vi = vf * inv_gt

            # max(r, 1/r) < t  <=>  (r < t) and (r * t > 1)   (r > 0)
            a1 = jnp.logical_and(r < t1, r * t1 > 1.0)
            a2 = jnp.logical_and(r < t2, r * t2 > 1.0)
            a3 = jnp.logical_and(r < t3, r * t3 > 1.0)

            def accum(m, arr):
                # mod-8 sublane reduction: vreg-aligned full-tile adds only
                # (no cross-lane/XLU work, no masked sub-vreg stores).
                red = arr[0:8, :]
                for g in range(1, n_groups):
                    red = red + arr[8 * g:8 * (g + 1), :]
                out_ref[0, 8 * m:8 * (m + 1), lanes] += red

            accum(0, vf)                                            # valid count
            accum(1, jnp.abs(diff) * vi)                            # abs_rel numerator
            accum(2, sq * vi)                                       # sqrt_rel numerator
            accum(3, vf * sq)                                       # rmse numerator
            accum(4, vf * (lr * lr))                                # rmse_log numerator
            accum(5, jnp.logical_and(a1, valid).astype(jnp.float32))
            accum(6, jnp.logical_and(a2, valid).astype(jnp.float32))
            accum(7, jnp.logical_and(a3, valid).astype(jnp.float32))

        if n_chunks == 1:
            process_chunk(0)
        else:
            def body(c, carry):
                process_chunk(pl.multiple_of(c * chunk_w, chunk_w))
                return carry
            lax.fori_loop(0, n_chunks, body, 0)

    return kernel


def mono_depth_evaluation(target_depth, kl, pred_disp, *, tile_h=None, chunk_w=None,
                          interp_dtype=jnp.float32):
    """
    target_depth: [B, 1, H, W]   (inputs['depth_l1'])
    kl:           [B, 3, 3]      (inputs['kl'])
    pred_disp:    [B, 1, h, w]   (outputs['disp_l1_pp'][0])
    interp_dtype: dtype for the interpolation operands (bf16 recommended on v5e).
    Returns dict of scalar metrics (abs_rel, sqrt_rel, rmse, rmse_log, a1, a2, a3).
    """
    B, _, H, W = target_depth.shape
    h_in, w_in = pred_disp.shape[2], pred_disp.shape[3]

    # Height tiling: one grid step per batch for H <= 384 (fills MXU M on v6e/v7x,
    # fewer per-step overheads); otherwise 256-row tiles.
    if tile_h is None:
        tile_h = _round_up(H, 8) if H <= 384 else 256
    tile_h = _round_up(int(tile_h), 8)
    H_pad = _round_up(H, tile_h)
    n_h = H_pad // tile_h

    # Lane chunking of the metric math (bounded temporaries per chunk).
    W_pad = _round_up(W, 128)
    if chunk_w is None:
        chunk_w = 512
    chunk_w = _round_up(min(int(chunk_w), W_pad), 128)
    while W_pad % chunk_w:
        chunk_w -= 128
    n_chunks = W_pad // chunk_w

    tgt = target_depth[:, 0].astype(jnp.float32)          # [B, H, W]
    # Zero-pad target: padded pixels have gt == 0 -> excluded by the valid mask.
    tgt = jnp.pad(tgt, ((0, 0), (0, H_pad - H), (0, W_pad - W)))

    disp = pred_disp[:, 0].astype(interp_dtype)           # [B, h, w]
    kvals = kl[:, 0, 0].astype(jnp.float32)               # [B]

    # Interpolation matrices, zero-padded to the padded output sizes.
    # The `* W` disparity scale is folded into the width matrix.
    wh_np = np.zeros((H_pad, h_in), np.float32)
    wh_np[:H] = _interp_matrix(H, h_in)
    wwt_np = np.zeros((w_in, W_pad), np.float32)
    wwt_np[:, :W] = _interp_matrix(W, w_in).T * np.float32(W)
    wh = jnp.asarray(wh_np, dtype=interp_dtype)            # [H_pad, h_in]
    wwt = jnp.asarray(wwt_np, dtype=interp_dtype)          # [w_in, W_pad]

    kernel = _make_kernel(tile_h, chunk_w, n_chunks)

    partials = pl.pallas_call(
        kernel,
        out_shape=jax.ShapeDtypeStruct((B, 64, W_pad), jnp.float32),
        grid_spec=pltpu.PrefetchScalarGridSpec(
            num_scalar_prefetch=0,
            grid=(B, n_h),
            in_specs=[
                pl.BlockSpec(memory_space=pltpu.MemorySpace.SMEM),          # kvals [B]
                pl.BlockSpec((1, h_in, w_in), lambda b, h: (b, 0, 0)),      # disp (per batch)
                pl.BlockSpec((1, tile_h, W_pad), lambda b, h: (b, h, 0)),   # target H-tile
                pl.BlockSpec((tile_h, h_in), lambda b, h: (h, 0)),          # Wh H-tile
                pl.BlockSpec((w_in, W_pad), lambda b, h: (0, 0)),           # Ww^T * W (constant)
            ],
            out_specs=pl.BlockSpec((1, 64, W_pad), lambda b, h: (b, 0, 0)),
            scratch_shapes=[pltpu.VMEM((h_in, W_pad), interp_dtype)],       # width-resized disp
        ),
        compiler_params=pltpu.CompilerParams(
            # batch axis parallel (megacore), H axis sequential (scratch reuse + accumulation)
            dimension_semantics=("parallel", "arbitrary"),
            vmem_limit_bytes=48 * 1024 * 1024,
        ),
    )(kvals, disp, tgt, wh, wwt)

    # Final cross-sublane / cross-lane / cross-batch reduction (tiny epilogue).
    sums = jnp.sum(partials.reshape(B, 8, 8, W_pad), axis=(0, 2, 3))         # [8]
    n = sums[0]
    inv_n = 1.0 / n
    return {
        'abs_rel': sums[1] * inv_n,
        'sqrt_rel': sums[2] * inv_n,
        'rmse': jnp.sqrt(sums[3] * inv_n),
        'rmse_log': jnp.sqrt(sums[4] * inv_n),
        'a1': sums[5] * inv_n,
        'a2': sums[6] * inv_n,
        'a3': sums[7] * inv_n,
    }


def _reference(target_depth, kl, pred_disp):
    """Pure-JAX reference with original PyTorch semantics (exact divides/logs)."""
    B, _, H, W = target_depth.shape
    h_in, w_in = pred_disp.shape[2], pred_disp.shape[3]
    wh = jnp.asarray(_interp_matrix(H, h_in))
    ww = jnp.asarray(_interp_matrix(W, w_in))
    x = pred_disp[:, 0].astype(jnp.float32)
    up = jnp.einsum('Hh,bhw->bHw', wh, x, precision='highest')
    up = jnp.einsum('bHw,Ww->bHW', up, ww, precision='highest')
    disp_scaled = up * jnp.float32(W)
    k = kl[:, 0, 0].astype(jnp.float32)[:, None, None]
    pos = (disp_scaled > 0.0).astype(jnp.float32)
    depth = k * 0.54 / (disp_scaled + (1.0 - pos))
    depth = jnp.clip(depth, 0.001, 80.0)
    gt = target_depth[:, 0].astype(jnp.float32)
    valid = (gt > 0.001) & (gt < 80.0)
    vf = valid.astype(jnp.float32)
    n = jnp.sum(vf)
    gt_s = jnp.where(valid, gt, 1.0)
    pd_s = jnp.where(valid, depth, 1.0)
    diff = gt_s - pd_s
    thresh = jnp.maximum(gt_s / pd_s, pd_s / gt_s)
    log_diff = jnp.log(gt_s) - jnp.log(pd_s)
    return {
        'abs_rel': jnp.sum(vf * jnp.abs(diff) / gt_s) / n,
        'sqrt_rel': jnp.sum(vf * diff * diff / gt_s) / n,
        'rmse': jnp.sqrt(jnp.sum(vf * diff * diff) / n),
        'rmse_log': jnp.sqrt(jnp.sum(vf * log_diff * log_diff) / n),
        'a1': jnp.sum(vf * (thresh < 1.25)) / n,
        'a2': jnp.sum(vf * (thresh < 1.25 ** 2)) / n,
        'a3': jnp.sum(vf * (thresh < 1.25 ** 3)) / n,
    }


if __name__ == "__main__":
    # Small stand-ins for the real shapes (target 375x1242, pred disp 192x640).
    # Chosen to exercise H padding (20 -> 32), W padding (300 -> 384),
    # multi-H-tile accumulation and the multi-lane-chunk path.
    B, H, W = 2, 20, 300
    h_in, w_in = 8, 32

    key = jax.random.PRNGKey(0)
    k1, k2, k3 = jax.random.split(key, 3)
    target_depth = jax.random.uniform(k1, (B, 1, H, W), jnp.float32, 0.0005, 90.0)
    pred_disp = jax.random.uniform(k2, (B, 1, h_in, w_in), jnp.float32, 0.005, 0.05)
    kl = jnp.zeros((B, 3, 3), jnp.float32)
    kl = kl.at[:, 0, 0].set(jax.random.uniform(k3, (B,), jnp.float32, 0.5, 2.0))

    ref = _reference(target_depth, kl, pred_disp)

    # Config 1: multi H-tile (tile_h=16 -> 2 tiles) and multi lane-chunk (3 chunks).
    m1 = mono_depth_evaluation(target_depth, kl, pred_disp, tile_h=16, chunk_w=128)
    m1 = {k: jax.block_until_ready(v) for k, v in m1.items()}
    for name, v in m1.items():
        np.testing.assert_allclose(np.asarray(v), np.asarray(ref[name]),
                                   rtol=5e-3, atol=1e-2)

    # Config 2: default tiling (single H tile per batch, single lane chunk).
    m2 = mono_depth_evaluation(target_depth, kl, pred_disp)
    m2 = {k: jax.block_until_ready(v) for k, v in m2.items()}
    for name, v in m2.items():
        np.testing.assert_allclose(np.asarray(v), np.asarray(ref[name]),
                                   rtol=5e-3, atol=1e-2)

    # Config 3: bf16 interpolation operands (v5e MXU path), looser tolerance.
    m3 = mono_depth_evaluation(target_depth, kl, pred_disp, interp_dtype=jnp.bfloat16)
    m3 = {k: jax.block_until_ready(v) for k, v in m3.items()}
    for name, v in m3.items():
        np.testing.assert_allclose(np.asarray(v), np.asarray(ref[name]),
                                   rtol=3e-2, atol=5e-2)

    print("KERNEL_OK")
</pallas_src>

<mosaic_0001>
module attributes {stable_mosaic.version = 11 : i64} {
  func.func @kernel(%arg0: i32, %arg1: i32, %arg2: memref<2xf32, #tpu.memory_space<smem>>, %arg3: memref<1x8x32xf32, #tpu.memory_space<vmem>>, %arg4: memref<1x16x384xf32, #tpu.memory_space<vmem>>, %arg5: memref<16x8xf32, #tpu.memory_space<vmem>>, %arg6: memref<32x384xf32, #tpu.memory_space<vmem>>, %arg7: memref<1x64x384xf32, #tpu.memory_space<vmem>>, %arg8: memref<8x384xf32, #tpu.memory_space<vmem>>) attributes {dimension_semantics = [#tpu.dimension_semantics<parallel>, #tpu.dimension_semantics<arbitrary>], iteration_bounds = array<i64: 2, 2>, scalar_prefetch = 0 : i64, scratch_operands = 1 : i64, tpu.core_type = #tpu.core_type<tc>, window_params = [{transform_indices = @transform_0, window_bounds = array<i64: 2>}, {transform_indices = @transform_1, window_bounds = array<i64: 1, 8, 32>}, {transform_indices = @transform_2, window_bounds = array<i64: 1, 16, 384>}, {transform_indices = @transform_3, window_bounds = array<i64: 16, 8>}, {pipeline_mode = #tpu.pipeline_mode<synchronous>, transform_indices = @transform_4, window_bounds = array<i64: 32, 384>}, {transform_indices = @transform_5, window_bounds = array<i64: 1, 64, 384>}]} {
    %c0_i32 = arith.constant 0 : i32
    %0 = arith.cmpi eq, %arg1, %c0_i32 : i32
    %1 = arith.extui %0 : i1 to i32
    %c0_i32_0 = arith.constant 0 : i32
    %2 = arith.cmpi ne, %1, %c0_i32_0 : i32
    scf.if %2 {
      %c0 = arith.constant 0 : index
      %c0_6 = arith.constant 0 : index
      %c0_7 = arith.constant 0 : index
      %7 = vector.load %arg3[%c0, %c0_6, %c0_7] : memref<1x8x32xf32, #tpu.memory_space<vmem>>, vector<1x8x32xf32>
      %8 = vector.shape_cast %7 : vector<1x8x32xf32> to vector<8x32xf32>
      %c0_8 = arith.constant 0 : index
      %c0_9 = arith.constant 0 : index
      %9 = vector.load %arg6[%c0_8, %c0_9] : memref<32x384xf32, #tpu.memory_space<vmem>>, vector<32x384xf32>
      %cst_10 = arith.constant dense<0.000000e+00> : vector<8x384xf32>
      %10 = tpu.matmul %8, %9, %cst_10 {dimension_numbers = #tpu.dot_dimension_numbers<[1], [0], [0], [1], [0, 0, 1, 1], [], []>} : vector<8x32xf32>, vector<32x384xf32>, vector<8x384xf32> -> vector<8x384xf32>
      %c0_11 = arith.constant 0 : index
      %c0_12 = arith.constant 0 : index
      %11 = vector.load %arg8[%c0_11, %c0_12] : memref<8x384xf32, #tpu.memory_space<vmem>>, vector<8x384xf32>
      tpu.vector_store %arg8[%c0_11, %c0_12], %10 {strides = array<i32>} : memref<8x384xf32, #tpu.memory_space<vmem>>, vector<8x384xf32>,
      %cst_13 = arith.constant 0.000000e+00 : f32
      %12 = vector.broadcast %cst_13 : f32 to vector<1x64x384xf32>
      %c0_14 = arith.constant 0 : index
      %c0_15 = arith.constant 0 : index
      %c0_16 = arith.constant 0 : index
      %13 = vector.load %arg7[%c0_14, %c0_15, %c0_16] : memref<1x64x384xf32, #tpu.memory_space<vmem>>, vector<1x64x384xf32>
      tpu.vector_store %arg7[%c0_14, %c0_15, %c0_16], %12 {strides = array<i32>} : memref<1x64x384xf32, #tpu.memory_space<vmem>>, vector<1x64x384xf32>,
    } else {
    }
    %3 = arith.index_cast %arg0 : i32 to index
    %4 = memref.load %arg2[%3] : memref<2xf32, #tpu.memory_space<smem>>
    %cst = arith.constant 5.400000e-01 : f32
    %5 = arith.mulf %4, %cst : f32
    %cst_1 = arith.constant 1.250000e+00 : f32
    %cst_2 = arith.constant 1.562500e+00 : f32
    %cst_3 = arith.constant 1.953125 : f32
    %c0_i32_4 = arith.constant 0 : i32
    %c3_i32 = arith.constant 3 : i32
    %6 = arith.addi %c0_i32_4, %c3_i32 : i32
    %c1_i32 = arith.constant 1 : i32
    scf.for %arg9 = %c0_i32_4 to %6 step %c1_i32  : i32 {
      %c128_i32 = arith.constant 128 : i32
      %7 = arith.muli %arg9, %c128_i32 : i32
      %8 = tpu.assume_multiple %7, 128 : i32
      %c0 = arith.constant 0 : index
      %c0_6 = arith.constant 0 : index
      %9 = vector.load %arg5[%c0, %c0_6] : memref<16x8xf32, #tpu.memory_space<vmem>>, vector<16x8xf32>
      %c0_7 = arith.constant 0 : index
      %10 = arith.index_cast %8 : i32 to index
      %11 = vector.load %arg8[%c0_7, %10] : memref<8x384xf32, #tpu.memory_space<vmem>>, vector<8x128xf32>
      %cst_8 = arith.constant dense<0.000000e+00> : vector<16x128xf32>
      %12 = tpu.matmul %9, %11, %cst_8 {dimension_numbers = #tpu.dot_dimension_numbers<[1], [0], [0], [1], [0, 0, 1, 1], [], []>} : vector<16x8xf32>, vector<8x128xf32>, vector<16x128xf32> -> vector<16x128xf32>
      %c0_9 = arith.constant 0 : index
      %c0_10 = arith.constant 0 : index
      %13 = arith.index_cast %8 : i32 to index
      %14 = vector.load %arg4[%c0_9, %c0_10, %13] : memref<1x16x384xf32, #tpu.memory_space<vmem>>, vector<1x16x128xf32>
      %15 = vector.shape_cast %14 : vector<1x16x128xf32> to vector<16x128xf32>
      %cst_11 = arith.constant 0.000000e+00 : f32
      %16 = vector.broadcast %cst_11 : f32 to vector<16x128xf32>
      %17 = arith.cmpf ogt, %12, %16 : vector<16x128xf32>
      %cst_12 = arith.constant 1.000000e+00 : f32
      %18 = vector.broadcast %cst_12 : f32 to vector<16x128xf32>
      %19 = arith.addf %12, %18 : vector<16x128xf32>
      %20 = arith.select %17, %12, %19 : vector<16x128xi1>, vector<16x128xf32>
      %21 = tpu.reciprocal %20 {approx = true} : vector<16x128xf32> -> vector<16x128xf32>
      %22 = vector.broadcast %5 : f32 to vector<16x128xf32>
      %23 = arith.mulf %22, %21 : vector<16x128xf32>
      %cst_13 = arith.constant 1.000000e-03 : f32
      %cst_14 = arith.constant 8.000000e+01 : f32
      %24 = vector.broadcast %cst_13 : f32 to vector<16x128xf32>
      %25 = arith.maximumf %24, %23 : vector<16x128xf32>
      %26 = vector.broadcast %cst_14 : f32 to vector<16x128xf32>
      %27 = arith.minimumf %26, %25 : vector<16x128xf32>
      %cst_15 = arith.constant 1.000000e-03 : f32
      %28 = vector.broadcast %cst_15 : f32 to vector<16x128xf32>
      %29 = arith.cmpf ogt, %15, %28 : vector<16x128xf32>
      %cst_16 = arith.constant 8.000000e+01 : f32
      %30 = vector.broadcast %cst_16 : f32 to vector<16x128xf32>
      %31 = arith.cmpf olt, %15, %30 : vector<16x128xf32>
      %32 = arith.andi %29, %31 : vector<16x128xi1>
      %33 = arith.extui %32 : vector<16x128xi1> to vector<16x128xi32>
      %34 = arith.sitofp %33 : vector<16x128xi32> to vector<16x128xf32>
      %cst_17 = arith.constant 1.000000e+00 : f32
      %35 = vector.broadcast %cst_17 : f32 to vector<16x128xf32>
      %36 = arith.select %32, %15, %35 : vector<16x128xi1>, vector<16x128xf32>
      %cst_18 = arith.constant 1.000000e+00 : f32
      %37 = vector.broadcast %cst_18 : f32 to vector<16x128xf32>
      %38 = arith.select %32, %27, %37 : vector<16x128xi1>, vector<16x128xf32>
      %39 = tpu.reciprocal %36 {approx = true} : vector<16x128xf32> -> vector<16x128xf32>
      %40 = arith.mulf %38, %39 : vector<16x128xf32>
      %41 = arith.subf %36, %38 : vector<16x128xf32>
      %42 = arith.mulf %41, %41 : vector<16x128xf32>
      %43 = math.log %40 : vector<16x128xf32>
      %44 = arith.mulf %34, %39 : vector<16x128xf32>
      %45 = vector.broadcast %cst_1 : f32 to vector<16x128xf32>
      %46 = arith.cmpf olt, %40, %45 : vector<16x128xf32>
      %47 = vector.broadcast %cst_1 : f32 to vector<16x128xf32>
      %48 = arith.mulf %40, %47 : vector<16x128xf32>
      %cst_19 = arith.constant 1.000000e+00 : f32
      %49 = vector.broadcast %cst_19 : f32 to vector<16x128xf32>
      %50 = arith.cmpf ogt, %48, %49 : vector<16x128xf32>
      %51 = arith.andi %46, %50 : vector<16x128xi1>
      %52 = vector.broadcast %cst_2 : f32 to vector<16x128xf32>
      %53 = arith.cmpf olt, %40, %52 : vector<16x128xf32>
      %54 = vector.broadcast %cst_2 : f32 to vector<16x128xf32>
      %55 = arith.mulf %40, %54 : vector<16x128xf32>
      %cst_20 = arith.constant 1.000000e+00 : f32
      %56 = vector.broadcast %cst_20 : f32 to vector<16x128xf32>
      %57 = arith.cmpf ogt, %55, %56 : vector<16x128xf32>
      %58 = arith.andi %53, %57 : vector<16x128xi1>
      %59 = vector.broadcast %cst_3 : f32 to vector<16x128xf32>
      %60 = arith.cmpf olt, %40, %59 : vector<16x128xf32>
      %61 = vector.broadcast %cst_3 : f32 to vector<16x128xf32>
      %62 = arith.mulf %40, %61 : vector<16x128xf32>
      %cst_21 = arith.constant 1.000000e+00 : f32
      %63 = vector.broadcast %cst_21 : f32 to vector<16x128xf32>
      %64 = arith.cmpf ogt, %62, %63 : vector<16x128xf32>
      %65 = arith.andi %60, %64 : vector<16x128xi1>
      %66 = vector.extract_strided_slice %34 {offsets = [0, 0], sizes = [8, 128], strides = [1, 1]} : vector<16x128xf32> to vector<8x128xf32>
      %67 = vector.extract_strided_slice %34 {offsets = [8, 0], sizes = [8, 128], strides = [1, 1]} : vector<16x128xf32> to vector<8x128xf32>
      %68 = arith.addf %66, %67 : vector<8x128xf32>
      %c0_22 = arith.constant 0 : index
      %c0_23 = arith.constant 0 : index
      %69 = arith.index_cast %8 : i32 to index
      %70 = vector.load %arg7[%c0_22, %c0_23, %69] : memref<1x64x384xf32, #tpu.memory_space<vmem>>, vector<1x8x128xf32>
      %71 = vector.shape_cast %70 : vector<1x8x128xf32> to vector<8x128xf32>
      %72 = arith.addf %71, %68 : vector<8x128xf32>
      %c0_24 = arith.constant 0 : index
      %c0_25 = arith.constant 0 : index
      %73 = arith.index_cast %8 : i32 to index
      %74 = vector.load %arg7[%c0_24, %c0_25, %73] : memref<1x64x384xf32, #tpu.memory_space<vmem>>, vector<1x8x128xf32>
      %75 = vector.shape_cast %74 : vector<1x8x128xf32> to vector<8x128xf32>
      %76 = vector.shape_cast %72 : vector<8x128xf32> to vector<1x8x128xf32>
      tpu.vector_store %arg7[%c0_24, %c0_25, %73], %76 {strides = array<i32>} : memref<1x64x384xf32, #tpu.memory_space<vmem>>, vector<1x8x128xf32>,
      %77 = math.absf %41 : vector<16x128xf32>
      %78 = arith.mulf %77, %44 : vector<16x128xf32>
      %79 = vector.extract_strided_slice %78 {offsets = [0, 0], sizes = [8, 128], strides = [1, 1]} : vector<16x128xf32> to vector<8x128xf32>
      %80 = vector.extract_strided_slice %78 {offsets = [8, 0], sizes = [8, 128], strides = [1, 1]} : vector<16x128xf32> to vector<8x128xf32>
      %81 = arith.addf %79, %80 : vector<8x128xf32>
      %c0_26 = arith.constant 0 : index
      %c8 = arith.constant 8 : index
      %82 = arith.index_cast %8 : i32 to index
      %83 = vector.load %arg7[%c0_26, %c8, %82] : memref<1x64x384xf32, #tpu.memory_space<vmem>>, vector<1x8x128xf32>
      %84 = vector.shape_cast %83 : vector<1x8x128xf32> to vector<8x128xf32>
      %85 = arith.addf %84, %81 : vector<8x128xf32>
      %c0_27 = arith.constant 0 : index
      %c8_28 = arith.constant 8 : index
      %86 = arith.index_cast %8 : i32 to index
      %87 = vector.load %arg7[%c0_27, %c8_28, %86] : memref<1x64x384xf32, #tpu.memory_space<vmem>>, vector<1x8x128xf32>
      %88 = vector.shape_cast %87 : vector<1x8x128xf32> to vector<8x128xf32>
      %89 = vector.shape_cast %85 : vector<8x128xf32> to vector<1x8x128xf32>
      tpu.vector_store %arg7[%c0_27, %c8_28, %86], %89 {strides = array<i32>} : memref<1x64x384xf32, #tpu.memory_space<vmem>>, vector<1x8x128xf32>,
      %90 = arith.mulf %42, %44 : vector<16x128xf32>
      %91 = vector.extract_strided_slice %90 {offsets = [0, 0], sizes = [8, 128], strides = [1, 1]} : vector<16x128xf32> to vector<8x128xf32>
      %92 = vector.extract_strided_slice %90 {offsets = [8, 0], sizes = [8, 128], strides = [1, 1]} : vector<16x128xf32> to vector<8x128xf32>
      %93 = arith.addf %91, %92 : vector<8x128xf32>
      %c0_29 = arith.constant 0 : index
      %c16 = arith.constant 16 : index
      %94 = arith.index_cast %8 : i32 to index
      %95 = vector.load %arg7[%c0_29, %c16, %94] : memref<1x64x384xf32, #tpu.memory_space<vmem>>, vector<1x8x128xf32>
      %96 = vector.shape_cast %95 : vector<1x8x128xf32> to vector<8x128xf32>
      %97 = arith.addf %96, %93 : vector<8x128xf32>
      %c0_30 = arith.constant 0 : index
      %c16_31 = arith.constant 16 : index
      %98 = arith.index_cast %8 : i32 to index
      %99 = vector.load %arg7[%c0_30, %c16_31, %98] : memref<1x64x384xf32, #tpu.memory_space<vmem>>, vector<1x8x128xf32>
      %100 = vector.shape_cast %99 : vector<1x8x128xf32> to vector<8x128xf32>
      %101 = vector.shape_cast %97 : vector<8x128xf32> to vector<1x8x128xf32>
      tpu.vector_store %arg7[%c0_30, %c16_31, %98], %101 {strides = array<i32>} : memref<1x64x384xf32, #tpu.memory_space<vmem>>, vector<1x8x128xf32>,
      %102 = arith.mulf %34, %42 : vector<16x128xf32>
      %103 = vector.extract_strided_slice %102 {offsets = [0, 0], sizes = [8, 128], strides = [1, 1]} : vector<16x128xf32> to vector<8x128xf32>
      %104 = vector.extract_strided_slice %102 {offsets = [8, 0], sizes = [8, 128], strides = [1, 1]} : vector<16x128xf32> to vector<8x128xf32>
      %105 = arith.addf %103, %104 : vector<8x128xf32>
      %c0_32 = arith.constant 0 : index
      %c24 = arith.constant 24 : index
      %106 = arith.index_cast %8 : i32 to index
      %107 = vector.load %arg7[%c0_32, %c24, %106] : memref<1x64x384xf32, #tpu.memory_space<vmem>>, vector<1x8x128xf32>
      %108 = vector.shape_cast %107 : vector<1x8x128xf32> to vector<8x128xf32>
      %109 = arith.addf %108, %105 : vector<8x128xf32>
      %c0_33 = arith.constant 0 : index
      %c24_34 = arith.constant 24 : index
      %110 = arith.index_cast %8 : i32 to index
      %111 = vector.load %arg7[%c0_33, %c24_34, %110] : memref<1x64x384xf32, #tpu.memory_space<vmem>>, vector<1x8x128xf32>
      %112 = vector.shape_cast %111 : vector<1x8x128xf32> to vector<8x128xf32>
      %113 = vector.shape_cast %109 : vector<8x128xf32> to vector<1x8x128xf32>
      tpu.vector_store %arg7[%c0_33, %c24_34, %110], %113 {strides = array<i32>} : memref<1x64x384xf32, #tpu.memory_space<vmem>>, vector<1x8x128xf32>,
      %114 = arith.mulf %43, %43 : vector<16x128xf32>
      %115 = arith.mulf %34, %114 : vector<16x128xf32>
      %116 = vector.extract_strided_slice %115 {offsets = [0, 0], sizes = [8, 128], strides = [1, 1]} : vector<16x128xf32> to vector<8x128xf32>
      %117 = vector.extract_strided_slice %115 {offsets = [8, 0], sizes = [8, 128], strides = [1, 1]} : vector<16x128xf32> to vector<8x128xf32>
      %118 = arith.addf %116, %117 : vector<8x128xf32>
      %c0_35 = arith.constant 0 : index
      %c32 = arith.constant 32 : index
      %119 = arith.index_cast %8 : i32 to index
      %120 = vector.load %arg7[%c0_35, %c32, %119] : memref<1x64x384xf32, #tpu.memory_space<vmem>>, vector<1x8x128xf32>
      %121 = vector.shape_cast %120 : vector<1x8x128xf32> to vector<8x128xf32>
      %122 = arith.addf %121, %118 : vector<8x128xf32>
      %c0_36 = arith.constant 0 : index
      %c32_37 = arith.constant 32 : index
      %123 = arith.index_cast %8 : i32 to index
      %124 = vector.load %arg7[%c0_36, %c32_37, %123] : memref<1x64x384xf32, #tpu.memory_space<vmem>>, vector<1x8x128xf32>
      %125 = vector.shape_cast %124 : vector<1x8x128xf32> to vector<8x128xf32>
      %126 = vector.shape_cast %122 : vector<8x128xf32> to vector<1x8x128xf32>
      tpu.vector_store %arg7[%c0_36, %c32_37, %123], %126 {strides = array<i32>} : memref<1x64x384xf32, #tpu.memory_space<vmem>>, vector<1x8x128xf32>,
      %127 = arith.andi %51, %32 : vector<16x128xi1>
      %128 = arith.extui %127 : vector<16x128xi1> to vector<16x128xi32>
      %129 = arith.sitofp %128 : vector<16x128xi32> to vector<16x128xf32>
      %130 = vector.extract_strided_slice %129 {offsets = [0, 0], sizes = [8, 128], strides = [1, 1]} : vector<16x128xf32> to vector<8x128xf32>
      %131 = vector.extract_strided_slice %129 {offsets = [8, 0], sizes = [8, 128], strides = [1, 1]} : vector<16x128xf32> to vector<8x128xf32>
      %132 = arith.addf %130, %131 : vector<8x128xf32>
      %c0_38 = arith.constant 0 : index
      %c40 = arith.constant 40 : index
      %133 = arith.index_cast %8 : i32 to index
      %134 = vector.load %arg7[%c0_38, %c40, %133] : memref<1x64x384xf32, #tpu.memory_space<vmem>>, vector<1x8x128xf32>
      %135 = vector.shape_cast %134 : vector<1x8x128xf32> to vector<8x128xf32>
      %136 = arith.addf %135, %132 : vector<8x128xf32>
      %c0_39 = arith.constant 0 : index
      %c40_40 = arith.constant 40 : index
      %137 = arith.index_cast %8 : i32 to index
      %138 = vector.load %arg7[%c0_39, %c40_40, %137] : memref<1x64x384xf32, #tpu.memory_space<vmem>>, vector<1x8x128xf32>
      %139 = vector.shape_cast %138 : vector<1x8x128xf32> to vector<8x128xf32>
      %140 = vector.shape_cast %136 : vector<8x128xf32> to vector<1x8x128xf32>
      tpu.vector_store %arg7[%c0_39, %c40_40, %137], %140 {strides = array<i32>} : memref<1x64x384xf32, #tpu.memory_space<vmem>>, vector<1x8x128xf32>,
      %141 = arith.andi %58, %32 : vector<16x128xi1>
      %142 = arith.extui %141 : vector<16x128xi1> to vector<16x128xi32>
      %143 = arith.sitofp %142 : vector<16x128xi32> to vector<16x128xf32>
      %144 = vector.extract_strided_slice %143 {offsets = [0, 0], sizes = [8, 128], strides = [1, 1]} : vector<16x128xf32> to vector<8x128xf32>
      %145 = vector.extract_strided_slice %143 {offsets = [8, 0], sizes = [8, 128], strides = [1, 1]} : vector<16x128xf32> to vector<8x128xf32>
      %146 = arith.addf %144, %145 : vector<8x128xf32>
      %c0_41 = arith.constant 0 : index
      %c48 = arith.constant 48 : index
      %147 = arith.index_cast %8 : i32 to index
      %148 = vector.load %arg7[%c0_41, %c48, %147] : memref<1x64x384xf32, #tpu.memory_space<vmem>>, vector<1x8x128xf32>
      %149 = vector.shape_cast %148 : vector<1x8x128xf32> to vector<8x128xf32>
      %150 = arith.addf %149, %146 : vector<8x128xf32>
      %c0_42 = arith.constant 0 : index
      %c48_43 = arith.constant 48 : index
      %151 = arith.index_cast %8 : i32 to index
      %152 = vector.load %arg7[%c0_42, %c48_43, %151] : memref<1x64x384xf32, #tpu.memory_space<vmem>>, vector<1x8x128xf32>
      %153 = vector.shape_cast %152 : vector<1x8x128xf32> to vector<8x128xf32>
      %154 = vector.shape_cast %150 : vector<8x128xf32> to vector<1x8x128xf32>
      tpu.vector_store %arg7[%c0_42, %c48_43, %151], %154 {strides = array<i32>} : memref<1x64x384xf32, #tpu.memory_space<vmem>>, vector<1x8x128xf32>,
      %155 = arith.andi %65, %32 : vector<16x128xi1>
      %156 = arith.extui %155 : vector<16x128xi1> to vector<16x128xi32>
      %157 = arith.sitofp %156 : vector<16x128xi32> to vector<16x128xf32>
      %158 = vector.extract_strided_slice %157 {offsets = [0, 0], sizes = [8, 128], strides = [1, 1]} : vector<16x128xf32> to vector<8x128xf32>
      %159 = vector.extract_strided_slice %157 {offsets = [8, 0], sizes = [8, 128], strides = [1, 1]} : vector<16x128xf32> to vector<8x128xf32>
      %160 = arith.addf %158, %159 : vector<8x128xf32>
      %c0_44 = arith.constant 0 : index
      %c56 = arith.constant 56 : index
      %161 = arith.index_cast %8 : i32 to index
      %162 = vector.load %arg7[%c0_44, %c56, %161] : memref<1x64x384xf32, #tpu.memory_space<vmem>>, vector<1x8x128xf32>
      %163 = vector.shape_cast %162 : vector<1x8x128xf32> to vector<8x128xf32>
      %164 = arith.addf %163, %160 : vector<8x128xf32>
      %c0_45 = arith.constant 0 : index
      %c56_46 = arith.constant 56 : index
      %165 = arith.index_cast %8 : i32 to index
      %166 = vector.load %arg7[%c0_45, %c56_46, %165] : memref<1x64x384xf32, #tpu.memory_space<vmem>>, vector<1x8x128xf32>
      %167 = vector.shape_cast %166 : vector<1x8x128xf32> to vector<8x128xf32>
      %168 = vector.shape_cast %164 : vector<8x128xf32> to vector<1x8x128xf32>
      tpu.vector_store %arg7[%c0_45, %c56_46, %165], %168 {strides = array<i32>} : memref<1x64x384xf32, #tpu.memory_space<vmem>>, vector<1x8x128xf32>,
    }
    %c3_i32_5 = arith.constant 3 : i32
    return
  }
  func.func @transform_0(%arg0: i32, %arg1: i32) -> i32 {
    %c0_i32 = arith.constant 0 : i32
    %c0_i32_0 = arith.constant 0 : i32
    return %c0_i32 : i32
  }
  func.func @transform_1(%arg0: i32, %arg1: i32) -> (i32, i32, i32) {
    %c0_i32 = arith.constant 0 : i32
    %c0_i32_0 = arith.constant 0 : i32
    %c0_i32_1 = arith.constant 0 : i32
    return %arg0, %c0_i32, %c0_i32_0 : i32, i32, i32
  }
  func.func @transform_2(%arg0: i32, %arg1: i32) -> (i32, i32, i32) {
    %c0_i32 = arith.constant 0 : i32
    %c0_i32_0 = arith.constant 0 : i32
    return %arg0, %arg1, %c0_i32 : i32, i32, i32
  }
  func.func @transform_3(%arg0: i32, %arg1: i32) -> (i32, i32) {
    %c0_i32 = arith.constant 0 : i32
    %c0_i32_0 = arith.constant 0 : i32
    return %arg1, %c0_i32 : i32, i32
  }
  func.func @transform_4(%arg0: i32, %arg1: i32) -> (i32, i32) {
    %c0_i32 = arith.constant 0 : i32
    %c0_i32_0 = arith.constant 0 : i32
    %c0_i32_1 = arith.constant 0 : i32
    return %c0_i32, %c0_i32_0 : i32, i32
  }
  func.func @transform_5(%arg0: i32, %arg1: i32) -> (i32, i32, i32) {
    %c0_i32 = arith.constant 0 : i32
    %c0_i32_0 = arith.constant 0 : i32
    %c0_i32_1 = arith.constant 0 : i32
    return %arg0, %c0_i32, %c0_i32_0 : i32, i32, i32
  }
}

</mosaic_0001>

<bundles_post_ra>
// kernel: tpu_custom_call.1
= control target key start
LH: loop header
LB: loop body
LE: loop exit
PB: predicated region body
PF: predicated region fallthrough
CT: control target
= control target key end

     0   :  { %s1858_s0 = inlined_call_operand.vmem [shape: f32[2], index: 0, kind: input, shape index: {}]   ;;  %s1859_s1 = inlined_call_operand.vmem [shape: f32[2,8,32], index: 1, kind: input, shape index: {}]   ;;  %s1860_s2 = inlined_call_operand.hbm [shape: f32[2,32,384], index: 2, kind: input, shape index: {}]   ;;  %s1861_s3 = inlined_call_operand.vmem [shape: f32[32,8], index: 3, kind: input, shape index: {}]   ;;  %s1862_s4 = inlined_call_operand.hbm [shape: f32[32,384], index: 4, kind: input, shape index: {}]   ;;  %s1863_s5 = inlined_call_operand.hbm [shape: f32[2,64,384], index: 5, kind: output, shape index: {}]  }
   0x1   :  { %1881 = sst [smem:[#allocation21_spill]] %s1858_s0 }
   0x2   :  { %1882 = sst [smem:[#allocation22_spill]] %s1862_s4 }
   0x3   :  { %1883 = sst [smem:[#allocation23_spill]] %s1863_s5 }
   0x4   :  { %10 = vsyncpa [#allocation6], 0 }
   0x5   :  { %11 = vsyncpa [#allocation4], 0 }
   0x6   :  { %13 = vsyncpa [#allocation4 + $0x1], 0 }
   0x7   :  { %14 = vsyncpa [#allocation9], 0 }
   0x8   :  { %15 = vsyncpa [#allocation5], 0 }
   0x9   :  { %17 = vsyncpa [#allocation5 + $0x1], 0  ;;  %s1394_s18 = smov 0   ;;  %s1396_s19 = smov 0  }
   0xa   :  { %s1398_s20 = smov 0   ;;  %s1400_s21 = smov 0  }
   0xb   :  { %s1402_s22 = smov 0   ;;  %s1404_s23 = smov 0  }
   0xc   :  { %s1406_s24 = smov 0   ;;  %s1408_s25 = smov 0  }
   0xd   :  { %s1410_s26 = smov 0   ;;  %s1412_s27 = smov 0  }
   0xe   :  { %s1414_s28 = smov 0  }
   0xf LB: > { %1884 = sst [smem:[#allocation15_spill]] %s1306_s18  ;;  %s909_s29 = sadd.s32 4294967295, %s1346_s28   ;;  %s1346_s28 = sphi %s1414_s28, %s23_s28   ;;  %s1342_s27 = sphi %s1412_s27, %s1939_s27   ;;  %s1338_s26 = sphi %s1410_s26, %s1931_s26   ;;  %s1334_s25 = sphi %s1408_s25, %s1938_s25   ;;  %s1330_s24 = sphi %s1406_s24, %s1930_s24   ;;  %s1326_s23 = sphi %s1404_s23, %s1937_s23   ;;  %s1322_s22 = sphi %s1402_s22, %s1936_s22   ;;  %s1318_s21 = sphi %s1400_s21, %s1935_s21   ;;  %s1314_s20 = sphi %s1398_s20, %s1934_s20   ;;  %s1310_s19 = sphi %s1396_s19, %s1933_s19   ;;  %s1306_s18 = sphi %s1394_s18, %s1932_s18  }
  0x10   : > { %1885 = sst [smem:[#allocation16_spill]] %s1338_s26  ;;  %s910_s30 = sadd.s32 4294967294, %s1346_s28  }
  0x11   : > { %1886 = sst [smem:[#allocation17_spill]] %s1346_s28  ;;  %p98_p0 = scmp.ne.s32.totalorder %s1326_s23, %s1322_s22 }
  0x12   : > { %p99_p1 = scmp.eq.s32.totalorder %s1346_s28, 0  ;;  %p104_p2 = scmp.ne.s32.totalorder %s1322_s22, %s1318_s21 }
  0x13   : > { %p1454_p3 = scmp.eq.s32.totalorder %s909_s29, 0  ;;  %p174_p5 = scmp.ne.s32.totalorder %s1314_s20, %s1310_s19 }
  0x14   : > { %p1458_p4 = por %p99_p1, %p98_p0  ;;  %p175_p7 = scmp.eq.s32.totalorder %s909_s29, 3 }
  0x15   : > { %s1887_s7 = scalar_select %p1454_p3, 1, 0 }
  0x16   : > { %p1466_p6 = por %p1454_p3, %p104_p2  ;;  %p180_p8 = scmp.ne.s32.totalorder %s1310_s19, %s1306_s18 }
  0x17   : > { %p181_p9 = scmp.eq.s32.totalorder %s910_s30, 3  ;;  %p1472_p10 = por %p175_p7, %p174_p5 }
  0x18   : > { %s1889_s9 = scalar_select %p1466_p6, 1, 0 }
  0x19   : > { %s1890_s10 = scalar_select %p1472_p10, 1, 0 }
  0x1a   : > { %p911_p11 = scmp.ge.s32.totalorder %s1346_s28, 1  ;;  %p1477_p12 = por %p181_p9, %p180_p8 }
  0x1b   : > { %1891 = sst [smem:[#allocation18_spill]] %s1890_s10  ;;  %p188_p13 = scmp.lt.s32.totalorder %s1346_s28, 5 }
  0x1c   : > { %s1892_s11 = scalar_select %p1477_p12, 1, 0 }
  0x1d   : > { %s1894_s0 = sld [smem:[#allocation21_spill]]  ;;  %p1485_p0 = pnand %p911_p11, %p188_p13 }
  0x1e   : > { %1893 = sst [smem:[#allocation19_spill]] %s1892_s11  ;;  %p1017_p2 = scmp.lt.s32.totalorder %s1346_s28, 4 }
  0x1f   : > { %s1895_s15 = scalar_select %p1485_p0, 1, 0 }
  0x20   : > { %p1000_p1 = pneg %p1485_p0  ;;  %p1500_p7 = pnand %p1017_p2, %p1458_p4 }
  0x21   : > { %s1352_s21 = smov [#allocation8]  }
  0x22   : > { %p1494_p5 = pnand %p1000_p1, %p1454_p3  ;;  %s211_s29 = sshll.u32 %s1352_s21, 4  ;;  %s212_s29 = int_to_ptr.vmem [resolvable:$true] %s211_s29 }
  0x23   : > { %s201_s14 = sshll.u32 %s1894_s0, 4  ;;  %s202_s14 = int_to_ptr.vmem [resolvable:$true] %s201_s14 }
  0x24   : > { %s1897_s17 = scalar_select %p1500_p7, 1, 0 }
  0x25   : > { %s1139_s30 = scalar_lea.vmem %s202_s14, 16  ;;  %p1141_p9 = pneg %p1494_p5 }
  0x26   : > { %p1140_p8 = scmp.ne.s32.totalorder %s202_s14, %s1139_s30  ;;  %p1147_p1 = scmp.lt.s32.totalorder %s202_s14, %s202_s14 }
  0x27   : > { %p1148_p12 = scmp.lt.s32.totalorder %s1139_s30, %s1139_s30 }
  0x28   : > { %p1142_p11 = pnand %p1141_p9, %p1140_p8 }
  0x29   : > { %p1149_p10 = por %p1148_p12, %p1147_p1 }
  0x2a   : > { %p1143_p13 = pneg %p1142_p11 }
  0x2c   : > { %p1150_p6 = pnand %p1149_p10, %p1143_p13 }
  0x2e   : > { %1153 = shalt.err (!%p1150_p6)
}
  0x2f   : > { %s1353_s8 = smov [#allocation3]   ;;  %s1898_s4 = sld [smem:[#allocation22_spill]] }
  0x30   : > { %1003 = dma.vmem_to_smem (!%p1494_p5), %s202_s14, 16, %s1353_s8, [#allocation6]  }
  0x35   : > { %s1154_s21 = scalar_lea.hbm %s1898_s4, 1536 }
  0x36   : > { %p1155_p4 = scmp.ne.s32.totalorder %s1898_s4, %s1154_s21  ;;  %p1161_p6 = scmp.lt.u32.totalorder %s1154_s21, %s1898_s4 }
  0x38   : > { %p1157_p2 = pnand %p1155_p4, %p1141_p9 }
  0x3a   : > { %p1158_p12 = pneg %p1157_p2 }
  0x3c   : > { %p1163_p10 = pnand %p1161_p6, %p1158_p12 }
  0x3e   : > { %1166 = shalt.err (!%p1163_p10)
}
  0x3f   : > { %s1167_s14 = scalar_lea.vmem %s212_s29, 1536  ;;  %p1175_p1 = scmp.lt.s32.totalorder %s212_s29, %s212_s29 }
  0x40   : > { %p1168_p8 = scmp.ne.s32.totalorder %s212_s29, %s1167_s14  ;;  %p1176_p3 = scmp.lt.s32.totalorder %s1167_s14, %s1167_s14 }
  0x42   : > { %p1170_p11 = pnand %p1168_p8, %p1141_p9  ;;  %p1177_p0 = por %p1176_p3, %p1175_p1 }
  0x44   : > { %p1171_p13 = pneg %p1170_p11 }
  0x46   : > { %p1178_p7 = pnand %p1177_p0, %p1171_p13 }
  0x48   : > { %1181 = shalt.err (!%p1178_p7)
}
  0x49   : > { %s1874_s0 = smov 384   ;;  %s1875_s6 = smov 24  }
  0x4a   : > { %1006 = dma.hbm_to_vmem [thread:$0]  (!%p1494_p5), %s1898_s4, 1536, %s212_s29, [#allocation9], %s1874_s0, %s1874_s0, %s1875_s6  }
  0x4b   : > { %s32_s12 = sadd.s32 1, %s1338_s26  ;;  %s35_s13 = sadd.s32 1, %s1342_s27 }
  0x4c   : > { %p33_p3 = scmp.ge.s32.totalorder %s32_s12, 2  ;;  %s164_s21 = sadd.s32 1, %s1314_s20 }
  0x4d   : > { %s232_s30 = sand.u32 1, %s1326_s23   ;;  %s983_s14 = smul.u32 6, %s1338_s26 }
  0x4e   : > { %s1941_s12 = smov (%p33_p3, %s32_s12), 0  ;;  %s1943_s13 = smov (!%p33_p3, %s35_s13), %s1342_s27 }
  0x4f   : > { %1899 = sst [smem:[#allocation20_spill]] %s1941_s12  ;;  %s87_s16 = ssub.s32 %s1338_s26, %s1941_s12 }
  0x50   : > { %p37_p0 = scmp.ge.s32.totalorder %s1943_s13, 2  ;;  %s982_s18 = smul.u32 48, %s232_s30 }
  0x51   : > { %s984_s28 = smul.u32 12, %s1342_s27  ;;  %s1900_s26 = sadd.s32 1, %s1326_s23 }
  0x52   : > { %s1945_s13 = smov (%p37_p0, %s1943_s13), 0  ;;  %p1901_p4 = scmp.ne.s32.totalorder %s1897_s17, 0 }
  0x53   : > { %s243_s29 = sadd.s32 %s984_s28, %s983_s14  ;;  %s86_s11 = ssub.s32 %s1342_s27, %s1945_s13 }
  0x54   : > { %s917_s8 = sshll.u32 %s243_s29, 7  ;;  %s88_s0 = sor.u32 %s87_s16, %s86_s11 }
  0x55   : > { %p162_p5 = scmp.eq.s32.totalorder %s86_s11, 0  ;;  %p89_p7 = scmp.eq.s32.totalorder %s88_s0, 0 }
  0x56   : > { %s1552_s5 = scalar_lea.hbm %s1860_s2, %s917_s8  ;;  %s236_s28 = scalar_lea.vmem [#allocation7], %s982_s18 }
  0x57   : > { %s1555_s12 = scalar_select %p162_p5, %s1314_s20, %s164_s21  }
  0x58   : > { %s1560_s10 = scalar_select %p89_p7, %s1326_s23, %s1900_s26  }
  0x59   : > { %s246_s14 = sshll.u32 %s236_s28, 4  ;;  %s1564_s16 = scalar_lea.sflag [#allocation4], %s232_s30  ;;  %s1562_s14 = int_to_ptr.vmem [resolvable:$true] %s246_s14 }
  0x5a   : > { %s1182_s0 = scalar_lea.hbm %s1552_s5, 768  ;;  %p1184_p2 = pneg %p1901_p4 }
  0x5b   : > { %p1183_p9 = scmp.ne.s32.totalorder %s1552_s5, %s1182_s0  ;;  %s1187_s21 = scalar_lea.hbm %s1860_s2, 3072 }
  0x5c   : > { %p1188_p10 = scmp.lt.u32.totalorder %s1552_s5, %s1860_s2  ;;  %p1189_p8 = scmp.lt.u32.totalorder %s1187_s21, %s1182_s0 }
  0x5d   : > { %p1185_p12 = pnand %p1184_p2, %p1183_p9  ;;  %p1191_p13 = scmp.lt.u32.totalorder %s1182_s0, %s1552_s5 }
  0x5e   : > { %p1190_p11 = por %p1189_p8, %p1188_p10 }
  0x5f   : > { %p1186_p6 = pneg %p1185_p12 }
  0x60   : > { %p1192_p1 = por %p1191_p13, %p1190_p11 }
  0x62   : > { %p1193_p3 = pnand %p1192_p1, %p1186_p6 }
  0x64   : > { %1196 = shalt.err (!%p1193_p3)
}
  0x65   : > { %s1197_s18 = scalar_lea.vmem %s1562_s14, 768  ;;  %s1356_s30 = smov [#allocation7]  }
  0x66   : > { %p1198_p0 = scmp.ne.s32.totalorder %s1562_s14, %s1197_s18  ;;  %s1202_s11 = sshll.u32 %s1356_s30, 4  ;;  %s1203_s11 = int_to_ptr.vmem [resolvable:$false] %s1202_s11 }
  0x67   : > { %s1204_s8 = scalar_lea.vmem %s1203_s11, 1536  ;;  %p1205_p9 = scmp.lt.s32.totalorder %s1562_s14, %s1203_s11 }
  0x68   : > { %p1200_p5 = pnand %p1198_p0, %p1184_p2  ;;  %p1206_p12 = scmp.lt.s32.totalorder %s1204_s8, %s1197_s18 }
  0x6a   : > { %p1201_p7 = pneg %p1200_p5  ;;  %p1207_p10 = por %p1206_p12, %p1205_p9 }
  0x6c   : > { %p1208_p8 = pnand %p1207_p10, %p1201_p7 }
  0x6e   : > { %1211 = shalt.err (!%p1208_p8)
}
  0x6f   : > { %s1902_s28 = smov 24   ;;  %s1903_s0 = smov 384  }
  0x70   : > { %1010 = dma.hbm_to_vmem [thread:$0]  (!%p1901_p4), %s1552_s5, 768, %s1562_s14, %s1564_s16, %s1903_s0, %s1903_s0, %s1902_s28  }
  0x71   : > { %p1904_p2 = scmp.ne.s32.totalorder %s1895_s15, 0 }
  0x72   : > { %p1905_p6 = scmp.ne.s32.totalorder (!%p1904_p2), %s1887_s7, 0 }
  0x73   : > { %267 = sbr.rel (%p1904_p2) target bundleno = 648 (0x288), region = 40 }
  0x7a   : > { %1289 = dma.done.wait (%p1905_p6), [#allocation6], 16  }
  0x7b   : > { %1291 = vsyncadd (%p1905_p6), [#allocation6], 4294967280  ;;  %s273_s4 = sand.u32 1, %s1322_s22   ;;  %p1906_p11 = scmp.ne.s32.totalorder %s1889_s9, 0 }
  0x7c   : > { %s1602_s17 = smul.u32 48, %s273_s4  ;;  %s274_s6 = scalar_lea.sflag [#allocation4], %s273_s4 }
  0x7e   : > { %s277_s21 = scalar_lea.vmem [#allocation7], %s1602_s17 }
  0x7f   : > { %1293 = dma.done.wait (%p1906_p11), %s274_s6, 768  }
  0x80   : > { %1295 = vsyncadd (%p1906_p11), %s274_s6, 4294966528 }
  0x81   : > { %1297 = dma.done.wait (%p1905_p6), [#allocation9], 1536  }
  0x82   : > { %1299 = vsyncadd (%p1905_p6), [#allocation9], 4294965760 }
  0x83   : > { %286 = sfence }
  0x84   : > { %s315_s5 = sand.u32 1, %s1310_s19   ;;  %p318_p4 = scmp.lt.s32.totalorder %s1334_s25, 1 }
  0x85   : > { %s986_s15 = smul.u32 192, %s315_s5  ;;  %s922_s14 = sshll.u32 %s1330_s24, 1 }
  0x86   : > { %s319_s16 = scalar_select %p318_p4, %s1334_s25, 1 }
  0x87   : > { %p324_p13 = scmp.lt.s32.totalorder %s922_s14, 3  ;;  %s1629_s28 = scalar_lea.vmem [#allocation10], %s986_s15 }
  0x88   : > { %s921_s9 = sshll.u32 %s319_s16, 3  ;;  %p924_p1 = scmp.ne.s32.totalorder %s1330_s24, 0 }
  0x89   : > { %s1622_s18 = scalar_lea.vmem %s1859_s1, %s921_s9  ;;  %s1947_s14 = smov (!%p324_p13, %s922_s14), 3  ;;  %v335_v0 = vld [vmem:[#allocation8 + $0x8] sm:$0xff] (!%p924_p1)  ;;  %v338_v1 = vld [vmem:[#allocation8 + $0x20] sm:$0xff] (!%p924_p1)  ;;  %v1357_v4 = vmov (!%p924_p1), 0.0|0.0   ;;  %v337_v5 = vld [vmem:[#allocation8 + $0x18] sm:$0xff] (!%p924_p1)  ;;  %v1358_v8 = vmov (!%p924_p1), 0.0  }
  0x8a   : > { %s923_s7 = sshll.u32 %s1947_s14, 3  ;;  %332 = sbr.rel (%p924_p1) target bundleno = 362 (0x16a), region = 56  ;;  %v334_v2 = vld [vmem:[#allocation8] sm:$0xff] (!%p924_p1)  ;;  %v968_v3 = vpack.c.bf16 (!%p924_p1), %v338_v1, %v335_v0  ;;  %976 = vmatprep.subr.bf16.mxu1 (!%p924_p1), %v1357_v4  ;;  %v336_v6 = vld [vmem:[#allocation8 + $0x10] sm:$0xff] (!%p924_p1)  ;;  %v339_v7 = vld [vmem:[#allocation8 + $0x28] sm:$0xff] (!%p924_p1)  ;;  %414 = vmatprep.mubr.f32.mxu0 (!%p924_p1), %v1358_v8  ;;  %494 = vst [vmem:[%s1629_s28] sm:$0xff] (!%p924_p1), %v1358_v8  ;;  %vm1359_vm0 = vmmov (!%p924_p1), 0  }
  0x8b   : > { %s1627_s8 = scalar_lea.vmem %s1861_s3, %s923_s7  ;;  %495 = vst [vmem:[%s1629_s28 + $0x8] sm:$0xff] (!%p924_p1), %v1358_v8  ;;  %496 = vst [vmem:[%s1629_s28 + $0x10] sm:$0xff] (!%p924_p1), %v1358_v8  ;;  %v970_v9 = vpack.c.bf16 (!%p924_p1), %v337_v5, %v334_v2  ;;  %v977_v10 = vpack.c.bf16 (!%p924_p1), %v339_v7, %v336_v6  ;;  %v341_v11 = vld [vmem:[#allocation8 + $0x38] sm:$0xff] (!%p924_p1)  ;;  %v344_v12 = vld [vmem:[#allocation8 + $0x50] sm:$0xff] (!%p924_p1)  ;;  %960 = vmatprep.mubr.msk.f32.mxu1 (!%p924_p1), %vm1359_vm0, %v1358_v8  ;;  %vm346_vm1 = vcmask (!%p924_p1), 261120  }
  0x8c   : > { %497 = vst [vmem:[%s1629_s28 + $0x18] sm:$0xff] (!%p924_p1), %v1358_v8  ;;  %498 = vst [vmem:[%s1629_s28 + $0x20] sm:$0xff] (!%p924_p1), %v1358_v8  ;;  %v340_v13 = vld [vmem:[#allocation8 + $0x30] sm:$0xff] (!%p924_p1)  ;;  %969 = vmatprep.subr.bf16.mxu0 (!%p924_p1), %v968_v3  ;;  %v972_v14 = vpack.c.bf16 (!%p924_p1), %v344_v12, %v341_v11  ;;  %v343_v15 = vld [vmem:[#allocation8 + $0x48] sm:$0xff] (!%p924_p1) }
  0x8d   : > { %499 = vst [vmem:[%s1629_s28 + $0x28] sm:$0xff] (!%p924_p1), %v1358_v8  ;;  %500 = vst [vmem:[%s1629_s28 + $0x30] sm:$0xff] (!%p924_p1), %v1358_v8  ;;  %v342_v16 = vld [vmem:[#allocation8 + $0x40] sm:$0xff] (!%p924_p1)  ;;  %v345_v17 = vld [vmem:[#allocation8 + $0x58] sm:$0xff] (!%p924_p1)  ;;  %971 = vmatpush1.bf16.msra.mxu0 (!%p924_p1), %v970_v9  ;;  %978 = vmatpush3.bf16.msra.mxu1 (!%p924_p1), %v977_v10  ;;  %v974_v18 = vpack.c.bf16 (!%p924_p1), %v343_v15, %v340_v13 }
  0x8e   : > { %501 = vst [vmem:[%s1629_s28 + $0x38] sm:$0xff] (!%p924_p1), %v1358_v8  ;;  %502 = vst [vmem:[%s1629_s28 + $0x40] sm:$0xff] (!%p924_p1), %v1358_v8  ;;  %v980_v19 = vpack.c.bf16 (!%p924_p1), %v345_v17, %v342_v16  ;;  %973 = vmatprep.subr.bf16.mxu0 (!%p924_p1), %v972_v14  ;;  %979 = vmatprep.subr.bf16.mxu1 (!%p924_p1), %v1357_v4  ;;  %v333_v20 = vld [vmem:[%s1622_s18] sm:$0xff] (!%p924_p1) }
  0x8f   : > { %503 = vst [vmem:[%s1629_s28 + $0x48] sm:$0xff] (!%p924_p1), %v1358_v8  ;;  %504 = vst [vmem:[%s1629_s28 + $0x50] sm:$0xff] (!%p924_p1), %v1358_v8 }
  0x90   : > { %505 = vst [vmem:[%s1629_s28 + $0x58] sm:$0xff] (!%p924_p1), %v1358_v8  ;;  %506 = vst [vmem:[%s1629_s28 + $0x60] sm:$0xff] (!%p924_p1), %v1358_v8 }
  0x91   : > { %507 = vst [vmem:[%s1629_s28 + $0x68] sm:$0xff] %v1358_v8  ;;  %508 = vst [vmem:[%s1629_s28 + $0x70] sm:$0xff] %v1358_v8  ;;  %975 = vmatpush1.bf16.msra.mxu0 %v974_v18  ;;  %981 = vmatpush3.bf16.msra.mxu1 %v980_v19 }
  0x92   : > { %509 = vst [vmem:[%s1629_s28 + $0x78] sm:$0xff] %v1358_v8  ;;  %510 = vst [vmem:[%s1629_s28 + $0x80] sm:$0xff] %v1358_v8 }
  0x93   : > { %511 = vst [vmem:[%s1629_s28 + $0x88] sm:$0xff] %v1358_v8  ;;  %512 = vst [vmem:[%s1629_s28 + $0x90] sm:$0xff] %v1358_v8 }
  0x94   : > { %513 = vst [vmem:[%s1629_s28 + $0x98] sm:$0xff] %v1358_v8  ;;  %514 = vst [vmem:[%s1629_s28 + $0xa0] sm:$0xff] %v1358_v8  ;;  %925 = vmatmul.mubr.msk.f32.vlgmr.msra.gmra.mrb[0].mxu0 %vm346_vm1, %v333_v20  ;;  %961 = vmatmul.mubr.msk.f32.vlgmr.msra.gmra.mrb[0].mxu1 %vm346_vm1, %v333_v20 }
  0x95   : > { %515 = vst [vmem:[%s1629_s28 + $0xa8] sm:$0xff] %v1358_v8  ;;  %516 = vst [vmem:[%s1629_s28 + $0xb0] sm:$0xff] %v1358_v8 }
  0x96   : > { %517 = vst [vmem:[%s1629_s28 + $0xb8] sm:$0xff] %v1358_v8 }
 0x167   : > { %v416_v21 = vpop.f32.mrb[0].mxu0  ;;  %v487_v22 = vpop.f32.mrb[0].mxu1 }
 0x168   : > { %491 = vst [vmem:[#allocation2] sm:$0xff] %v416_v21  ;;  %493 = vst [vmem:[#allocation2 + $0x10] sm:$0xff] %v487_v22  ;;  %v418_v23 = vpop.f32.mrb[1].mxu0  ;;  %v962_v24 = vpop.f32.mrb[1].mxu1 }
 0x169   : > { %492 = vst [vmem:[#allocation2 + $0x8] sm:$0xff] %v418_v23 }
 0x16a PF: > { %s1658_s24 = sld [smem:[#allocation3 + %s1334_s25]]  ;;  %s1661_s4 = smov 0  }
 0x170   : > { %s519_s0 = smul.f32 0.54, %s1658_s24 }
 0x171 LB: >> { %v527_v25 = vld [vmem:[%s1627_s8] sm:$0xff]  ;;  %vm534_vm2 = vcmask 64512   ;;  %s927_s6 = sshll.u32 %s1350_s4, 7  ;;  %v528_v26 = vld [vmem:[%s1627_s8 + $0x8] sm:$0xff]  ;;  %v1360_v32 = vmov 0.0   ;;  %s525_s4 = sadd.s32 1, %s1350_s4   ;;  %s1350_s4 = sphi %s1661_s4, %s525_s4  }
 0x172   : >> { %965 = vmatprep.mubr.msk.f32.mxu0 %vm534_vm2, %v527_v25  ;;  %s529_s15 = sshra.s32 %s927_s6, 7  ;;  %v628_v46 = vstv %s519_s0  ;;  %p522_p3 = scmp.ge.s32.totalorder %s525_s4, 3  }
 0x173   : >> { %s928_s14 = sshll.u32 %s529_s15, 3  ;;  %s1923_s29 = sld [smem:[#allocation18_spill]] (%p522_p3) }
 0x174   : >> { %s617_s16 = scalar_lea.vmem %s277_s21, %s928_s14 [#allocation7]  ;;  %s532_s9 = scalar_lea.vmem [#allocation2], %s928_s14 }
 0x175   : >> { %v533_v27 = vld [vmem:[%s532_s9] sm:$0xff]  ;;  %v619_v29 = vld [vmem:[%s617_s16 + $0x18] sm:$0xff]  ;;  %s1681_s26 = scalar_lea.vmem %s1629_s28, %s928_s14 [#allocation10]  ;;  %s987_s18 = smul.u32 (%p522_p3), 3072, %s1334_s25 }
 0x176   : >> { %v618_v28 = vld [vmem:[%s617_s16] sm:$0xff]  ;;  %963 = vmatprep.subr.mxu0 %v533_v27  ;;  %vm636_vm4 = vcmp.gt.f32.partialorder %v619_v29, 0.001  ;;  %vm638_vm6 = vcmp.lt.f32.partialorder %v619_v29, 80.0  ;;  %v704_v18 = vld [vmem:[%s1681_s26 + $0x30] sm:$0xff]  ;;  %v698_v25 = vld [vmem:[%s1681_s26 + $0x18] sm:$0xff] }
 0x177   : >> { %vm635_vm3 = vcmp.gt.f32.partialorder %v618_v28, 0.001  ;;  %vm637_vm5 = vcmp.lt.f32.partialorder %v618_v28, 80.0  ;;  %964 = vmatpush3.msra.mxu0 %v533_v27  ;;  %vm1676_vm8 = vmand %vm636_vm4, %vm638_vm6  ;;  %v690_v35 = vld [vmem:[%s1681_s26] sm:$0xff]  ;;  %s765_s7 = sshll.u32 (%p522_p3), %s1629_s28, 4  ;;  %s1924_s6 = sld [smem:[#allocation23_spill]] (%p522_p3)  ;;  %s1793_s7 = int_to_ptr.vmem [resolvable:$true] %s765_s7 }
 0x178   : >> { %vm1672_vm7 = vmand %vm635_vm3, %vm637_vm5  ;;  %966 = vmatmul.mubr.msk.f32.vlgmr.msra.gmra.mrb[0].mxu0 %vm534_vm2, %v528_v26  ;;  %v1692_v34 = vsel %vm1676_vm8, 1.0, %v1360_v32  ;;  %v646_v44 = vsel %vm1676_vm8, %v619_v29, 1.0  ;;  %v710_v26 = vld [vmem:[%s1681_s26 + $0x48] sm:$0xff]  ;;  %s1797_s14 = scalar_lea.sflag (%p522_p3), [#allocation5], %s315_s5  ;;  %s1212_s4 = scalar_lea.vmem (%p522_p3), %s1793_s7, 3072 }
 0x179   : >> { %v1687_v33 = vsel %vm1672_vm7, 1.0, %v1360_v32  ;;  %v645_v45 = vsel %vm1672_vm7, %v618_v28, 1.0  ;;  %p1213_p0 = scmp.ne.s32.totalorder (%p522_p3), %s1793_s7, %s1212_s4  ;;  %p1925_p5 = scmp.ne.s32.totalorder (%p522_p3), %s1923_s29, 0 }
 0x17a   : >> { %v687_v36 = vadd.f32 %v1692_v34, %v1687_v33  ;;  %s1361_s25 = smov (%p522_p3), [#allocation10]  }
 0x17b   : > { %p1214_p7 = pnand (%p522_p3), %p1213_p0, %p1925_p5  ;;  %s1216_s17 = sshll.u32 (%p522_p3), %s1361_s25, 4  ;;  %s1217_s17 = int_to_ptr.vmem [resolvable:$false] %s1216_s17 }
 0x17c   : >> { %v691_v37 = vadd.f32 %v690_v35, %v687_v36  ;;  %s1218_s21 = scalar_lea.vmem (%p522_p3), %s1217_s17, 6144  ;;  %p1219_p12 = scmp.lt.s32.totalorder (%p522_p3), %s1793_s7, %s1217_s17 }
 0x17d   : > { %s1791_s15 = scalar_lea.hbm (%p522_p3), %s1924_s6, %s987_s18  ;;  %p1215_p9 = pneg (%p522_p3), %p1214_p7 }
 0x17e   : >> { %692 = vst [vmem:[%s1681_s26] sm:$0xff] %v691_v37  ;;  %p1220_p10 = scmp.lt.s32.totalorder (%p522_p3), %s1218_s21, %s1212_s4 }
 0x180   : > { %p1221_p8 = por (%p522_p3), %p1220_p10, %p1219_p12 }
 0x182   : > { %p1222_p2 = pnand (%p522_p3), %p1221_p8, %p1215_p9 }
 0x24b   : >> { %v967_v38 = vpop.f32.mrb[0].mxu0 }
 0x24c   : >> { %vm621_vm9 = vcmp.gt.f32.partialorder %v967_v38, 0.0  ;;  %v623_v39 = vadd.f32 1.0, %v967_v38  ;;  %v607_v40 = vpop.f32.mrb[1].mxu0 }
 0x24d   : >> { %vm620_vm10 = vcmp.gt.f32.partialorder %v607_v40, 0.0  ;;  %v622_v41 = vadd.f32 1.0, %v607_v40 }
 0x24e   : >> { %v625_v42 = vsel %vm621_vm9, %v967_v38, %v623_v39 }
 0x24f   : >> { %1127 = vrcp.f32 %v625_v42  ;;  %v624_v43 = vsel %vm620_vm10, %v607_v40, %v622_v41  ;;  %v728_v42 = vld [vmem:[%s1681_s26 + $0x78] sm:$0xff] }
 0x250   : >> { %1129 = vrcp.f32 %v624_v43 }
 0x251   : >> { %1131 = vrcp.f32 %v646_v44 }
 0x252   : >> { %1133 = vrcp.f32 %v645_v45 }
 0x259   : >> { %v1128_v47 = vpop.eup %1127 }
 0x25a   : >> { %v1130_v48 = vpop.eup %1129  ;;  %v630_v49 = vmul.f32 %v1128_v47, %v628_v46 }
 0x25b   : >> { %v629_v50 = vmul.f32 %v1130_v48, %v628_v46  ;;  %v1132_v53 = vpop.eup %1131  ;;  %v738_v48 = vld [vmem:[%s1681_s26 + $0x90] sm:$0xff] }
 0x25c   : >> { %v632_v51 = vmax.f32 %v630_v49, 0.001  ;;  %v1134_v55 = vpop.eup %1133  ;;  %v662_v0 = vmul.f32 %v1132_v53, %v1692_v34 }
 0x25d   : >> { %v631_v52 = vmax.f32 %v629_v50, 0.001  ;;  %v661_v61 = vmul.f32 %v1134_v55, %v1687_v33 }
 0x25e   : >> { %v634_v54 = vmin.f32 %v632_v51, 80.0 }
 0x25f   : >> { %v633_v56 = vmin.f32 %v631_v52, 80.0 }
 0x260   : >> { %v648_v57 = vsel %vm1676_vm8, %v634_v54, 1.0  ;;  %v748_v54 = vld [vmem:[%s1681_s26 + $0xa8] sm:$0xff] }
 0x261   : >> { %v647_v58 = vsel %vm1672_vm7, %v633_v56, 1.0  ;;  %v652_v59 = vmul.f32 %v1132_v53, %v648_v57  ;;  %v654_v60 = vsub.f32 %v646_v44, %v648_v57 }
 0x262   : >> { %v651_v62 = vmul.f32 %v1134_v55, %v647_v58  ;;  %v653_v63 = vsub.f32 %v645_v45, %v647_v58  ;;  %v718_v58 = vld [vmem:[%s1681_s26 + $0x60] sm:$0xff] }
 0x263   : >> { %v656_v1 = vmul.f32 %v654_v60, %v654_v60  ;;  %1135 = vlog2.f32 %v652_v59  ;;  %v666_v2 = vmul.f32 1.25, %v652_v59  ;;  %vm664_vm11 = vcmp.lt.f32.partialorder %v652_v59, 1.25 }
 0x264   : >> { %v655_v3 = vmul.f32 %v653_v63, %v653_v63  ;;  %1137 = vlog2.f32 %v651_v62  ;;  %v665_v4 = vmul.f32 1.25, %v651_v62  ;;  %vm663_vm12 = vcmp.lt.f32.partialorder %v651_v62, 1.25 }
 0x265   : >> { %vm668_vm13 = vcmp.gt.f32.partialorder %v666_v2, 1.0  ;;  %vm671_vm14 = vcmp.lt.f32.partialorder %v651_v62, 1.5625  ;;  %v673_v5 = vmul.f32 1.5625, %v651_v62  ;;  %vm672_vm1 = vcmp.lt.f32.partialorder %v652_v59, 1.5625 }
 0x266   : >> { %vm667_vm15 = vcmp.gt.f32.partialorder %v665_v4, 1.0  ;;  %vm1710_vm0 = vmand %vm664_vm11, %vm668_vm13  ;;  %v674_v7 = vmul.f32 1.5625, %v652_v59  ;;  %vm679_vm2 = vcmp.lt.f32.partialorder %v651_v62, 1.953125  ;;  %v681_v9 = vmul.f32 1.953125, %v651_v62 }
 0x267   : >> { %vm1714_vm3 = vmand %vm663_vm12, %vm667_vm15  ;;  %vm675_vm4 = vcmp.gt.f32.partialorder %v673_v5, 1.0  ;;  %v682_v10 = vmul.f32 1.953125, %v652_v59  ;;  %v693_v11 = vand.u32 2147483647, %v653_v63  ;;  %v694_v13 = vand.u32 2147483647, %v654_v60 }
 0x268   : >> { %vm676_vm5 = vcmp.gt.f32.partialorder %v674_v7, 1.0  ;;  %vm1718_vm6 = vmand %vm671_vm14, %vm675_vm4  ;;  %v701_v14 = vmul.f32 %v661_v61, %v655_v3  ;;  %v702_v15 = vmul.f32 %v662_v0, %v656_v1  ;;  %vm683_vm10 = vcmp.gt.f32.partialorder %v681_v9, 1.0 }
 0x269   : >> { %vm1722_vm9 = vmand %vm672_vm1, %vm676_vm5  ;;  %vm684_vm11 = vcmp.gt.f32.partialorder %v682_v10, 1.0  ;;  %v695_v17 = vmul.f32 %v693_v11, %v661_v61  ;;  %v707_v19 = vmul.f32 %v1687_v33, %v655_v3  ;;  %vm680_vm12 = vcmp.lt.f32.partialorder %v652_v59, 1.953125 }
 0x26a   : >> { %vm1729_vm13 = vmand %vm679_vm2, %vm683_vm10  ;;  %v696_v21 = vmul.f32 %v694_v13, %v662_v0  ;;  %v703_v22 = vadd.f32 %v702_v15, %v701_v14  ;;  %v708_v23 = vmul.f32 %v1692_v34, %v656_v1 }
 0x26b   : >> { %vm1734_vm14 = vmand %vm680_vm12, %vm684_vm11 }
 0x26c   : >> { %v697_v27 = vadd.f32 %v696_v21, %v695_v17  ;;  %v705_v28 = vadd.f32 %v704_v18, %v703_v22  ;;  %v709_v29 = vadd.f32 %v708_v23, %v707_v19  ;;  %vm721_vm15 = vmand %vm1714_vm3, %vm1672_vm7 }
 0x26d   : >> { %v1136_v35 = vpop.eup %1135  ;;  %vm722_vm1 = vmand %vm1710_vm0, %vm1676_vm8  ;;  %v935_v36 = vsel %vm721_vm15, 1.0, %v1360_v32 }
 0x26e   : >> { %v1138_v37 = vpop.eup %1137  ;;  %v660_v38 = vmul.f32 0.6931472, %v1136_v35  ;;  %v699_v39 = vadd.f32 %v698_v25, %v697_v27  ;;  %706 = vst [vmem:[%s1681_s26 + $0x30] sm:$0xff] %v705_v28  ;;  %v711_v40 = vadd.f32 %v710_v26, %v709_v29  ;;  %v936_v41 = vsel %vm722_vm1, 1.0, %v1360_v32  ;;  %vm731_vm2 = vmand %vm1718_vm6, %vm1672_vm7 }
 0x26f   : >> { %v658_v43 = vmul.f32 0.6931472, %v1138_v37  ;;  %v727_v44 = vadd.f32 %v936_v41, %v935_v36  ;;  %vm732_vm0 = vmand %vm1722_vm9, %vm1676_vm8  ;;  %v937_v45 = vsel %vm731_vm2, 1.0, %v1360_v32 }
 0x270   : >> { %700 = vst [vmem:[%s1681_s26 + $0x18] sm:$0xff] %v699_v39  ;;  %712 = vst [vmem:[%s1681_s26 + $0x48] sm:$0xff] %v711_v40  ;;  %v714_v46 = vmul.f32 %v660_v38, %v660_v38  ;;  %v938_v47 = vsel %vm732_vm0, 1.0, %v1360_v32 }
 0x271   : >> { %vm741_vm3 = vmand %vm1729_vm13, %vm1672_vm7  ;;  %v713_v49 = vmul.f32 %v658_v43, %v658_v43  ;;  %v729_v50 = vadd.f32 %v728_v42, %v727_v44  ;;  %v737_v51 = vadd.f32 %v938_v47, %v937_v45 }
 0x272   : >> { %vm742_vm4 = vmand %vm1734_vm14, %vm1676_vm8  ;;  %v939_v52 = vsel %vm741_vm3, 1.0, %v1360_v32  ;;  %v716_v53 = vmul.f32 %v1692_v34, %v714_v46 }
 0x273   : >> { %v940_v30 = vsel %vm742_vm4, 1.0, %v1360_v32  ;;  %v715_v55 = vmul.f32 %v1687_v33, %v713_v49  ;;  %730 = vst [vmem:[%s1681_s26 + $0x78] sm:$0xff] %v729_v50  ;;  %v739_v56 = vadd.f32 %v738_v48, %v737_v51  ;;  %524 = sbr.rel (!%p522_p3) target bundleno = 369 (0x171), region = 114 }
 0x274   : >> { %v747_v57 = vadd.f32 %v940_v30, %v939_v52 }
 0x275   : >> { %v717_v59 = vadd.f32 %v716_v53, %v715_v55  ;;  %740 = vst [vmem:[%s1681_s26 + $0x90] sm:$0xff] %v739_v56 }
 0x276   : >> { %v749_v31 = vadd.f32 %v748_v54, %v747_v57 }
 0x277   : >> { %v719_v60 = vadd.f32 %v718_v58, %v717_v59 }
 0x278   : >> { %750 = vst [vmem:[%s1681_s26 + $0xa8] sm:$0xff] %v749_v31 }
 0x279   : >> { %720 = vst [vmem:[%s1681_s26 + $0x60] sm:$0xff] %v719_v60 }
 0x27a   : > { %1225 = shalt.err (!%p1222_p2)
}
 0x27b   : > { %s1226_s5 = scalar_lea.hbm %s1791_s15, 3072  ;;  %s1230_s24 = scalar_lea.hbm %s1924_s6, 6144 }
 0x27c   : > { %p1227_p6 = scmp.ne.s32.totalorder %s1791_s15, %s1226_s5  ;;  %p1231_p13 = scmp.lt.u32.totalorder %s1791_s15, %s1924_s6 }
 0x27d   : > { %p1232_p1 = scmp.lt.u32.totalorder %s1230_s24, %s1226_s5  ;;  %p1234_p0 = scmp.lt.u32.totalorder %s1226_s5, %s1791_s15 }
 0x27e   : > { %p1228_p11 = pnand %p1227_p6, %p1925_p5 }
 0x27f   : > { %p1233_p3 = por %p1232_p1, %p1231_p13 }
 0x280   : > { %p1229_p4 = pneg %p1228_p11 }
 0x281   : > { %p1235_p7 = por %p1234_p0, %p1233_p3 }
 0x283   : > { %p1236_p9 = pnand %p1235_p7, %p1229_p4 }
 0x285   : > { %1239 = shalt.err (!%p1236_p9)
}
 0x286   : > { %s1362_s9 = smov 384   ;;  %s1363_s26 = smov 24  }
 0x287   : > { %998 = dma.vmem_to_hbm [thread:$0]  (%p1925_p5), %s1793_s7, 3072, %s1791_s15, %s1797_s14, %s1362_s9, %s1362_s9, %s1363_s26  }
 0x288 PF: > { %s1926_s18 = sld [smem:[#allocation17_spill]]  ;;  %s1927_s30 = sld [smem:[#allocation15_spill]] }
 0x289   : > { %s1928_s11 = sld [smem:[#allocation19_spill]] }
 0x28e   : > { %p1020_p12 = scmp.ge.s32.totalorder %s1926_s18, 2  ;;  %s780_s4 = sand.u32 1, %s1927_s30  }
 0x28f   : > { %p1929_p10 = scmp.ne.s32.totalorder %s1928_s11, 0  ;;  %s781_s25 = scalar_lea.sflag [#allocation5], %s780_s4 }
 0x291   : > { %p1012_p8 = pnand %p1020_p12, %p1929_p10 }
 0x293   : > { %1301 = dma.done.wait (!%p1012_p8), %s781_s25, 3072  }
 0x294   : > { %1303 = vsyncadd (!%p1012_p8), %s781_s25, 4294964224  ;;  %s23_s28 = sadd.s32 1, %s1926_s18   ;;  %s1930_s24 = sld [smem:[#allocation16_spill]] }
 0x295   : > { %p20_p2 = scmp.ge.s32.totalorder %s23_s28, 6   ;;  %s1931_s26 = sld [smem:[#allocation20_spill]] }
 0x296   : > { %s1932_s18 = smov %s1310_s19  ;;  %s1933_s19 = smov %s1314_s20 }
 0x297   : > { %s1934_s20 = smov %s1555_s12  ;;  %s1935_s21 = smov %s1322_s22 }
 0x298   : > { %s1936_s22 = smov %s1326_s23  ;;  %s1937_s23 = smov %s1560_s10 }
 0x299   : > { %s1938_s25 = smov %s1342_s27  ;;  %s1939_s27 = smov %s1945_s13 }
 0x29a   :  { %22 = sbr.rel (!%p20_p2) target bundleno = 15 (0xf), region = 125 }
 0x2a1   :  { %786 = vsyncpa [#allocation4], 1 }
 0x2a2   :  { %788 = vsyncpa [#allocation4 + $0x1], 1 }
 0x2a3   :  { %789 = vsyncpa [#allocation9], 1 }
 0x2a4   :  { %790 = vsyncpa [#allocation5], 1 }
 0x2a5   :  { %792 = vsyncpa [#allocation5 + $0x1], 1 }
 0x2a6   :  { %793 = vsyncpa [#allocation6], 1 }
 0x2a7   :  { %795 = vsyncpa [#allocation6 + $0x1], 1 }

</bundles_post_ra>
